<compile_context>
chip_gen: v7x
topology: tpu7x:2x2x1
jax: 0.10.0
libtpu: 0.0.40
codegen_flags: <defaults>
</compile_context>

<pallas_src>
import jax
import jax.numpy as jnp
from jax.experimental import pallas as pl
from jax.experimental.pallas import tpu as pltpu

B = 256        # batch of observations (amortizes per-call / per-step overhead)
TB = 128       # batch tile per grid step (sublane-aligned, lane-friendly)
OBS_DIM = 16   # observation_space.n
ACT_DIM = 8    # action_space.n

# packed output layout
_V_COL = ACT_DIM          # column holding v
_LOGP_COL = ACT_DIM + 1   # column holding logp_a
_OUT_W = ACT_DIM + 2      # packed output width


def _sac_kernel(obs_ref, act_ref, tab_ref, out_ref):
    # obs_ref / act_ref : (TB, 1) int32
    # tab_ref           : (OBS_DIM, ACT_DIM+1) f32  -- [:, :ACT_DIM]=logits, [:, ACT_DIM]=v
    # out_ref           : (TB, ACT_DIM+2) f32 packed output slab
    obs = obs_ref[...]                                            # (TB, 1)
    act = act_ref[...]                                            # (TB, 1)

    # one-hot(obs) : (TB, OBS_DIM) — fused row gather via a single MXU matmul
    obs_iota = jax.lax.broadcasted_iota(jnp.int32, (TB, OBS_DIM), 1)
    onehot_obs = (obs == obs_iota).astype(jnp.float32)

    # (TB, OBS_DIM) @ (OBS_DIM, ACT_DIM+1) -> (TB, ACT_DIM+1): logits + v in one pass
    gathered = jnp.dot(onehot_obs, tab_ref[...],
                       preferred_element_type=jnp.float32)
    raw_logits = gathered[:, :ACT_DIM]                            # (TB, ACT_DIM)
    v = gathered[:, ACT_DIM:ACT_DIM + 1]                          # (TB, 1)

    # Categorical normalization (log-softmax over the action axis)
    m = jnp.max(raw_logits, axis=-1, keepdims=True)
    shifted = raw_logits - m
    log_probs = shifted - jnp.log(jnp.sum(jnp.exp(shifted), axis=-1, keepdims=True))

    # logp_a = pi.log_prob(act): NaN-safe masked select + lane reduction (XLU)
    act_iota = jax.lax.broadcasted_iota(jnp.int32, (TB, ACT_DIM), 1)
    logp_a = jnp.sum(jnp.where(act == act_iota, log_probs, 0.0),
                     axis=-1, keepdims=True)                      # (TB, 1)

    # One packed store -> one output block / one writeback DMA.
    out_ref[...] = jnp.concatenate([log_probs, v, logp_a], axis=-1)


def state_actor_critic_forward(obs, act, v_matrix, pi_logit_matrix):
    """Returns (pi_logits [normalized], v, logp_a) — mirrors module.forward."""
    assert obs.shape[0] == B and B % TB == 0
    obs2 = obs.reshape(B, 1).astype(jnp.int32)
    act2 = act.reshape(B, 1).astype(jnp.int32)

    # Fuse v as an extra column of the logit table: (OBS_DIM, ACT_DIM+1)
    fused_tab = jnp.concatenate(
        [pi_logit_matrix.astype(jnp.float32),
         v_matrix.reshape(OBS_DIM, 1).astype(jnp.float32)], axis=1)

    out = pl.pallas_call(
        _sac_kernel,
        out_shape=jax.ShapeDtypeStruct((B, _OUT_W), jnp.float32),
        grid=(B // TB,),
        in_specs=[
            pl.BlockSpec((TB, 1), lambda i: (i, 0)),
            pl.BlockSpec((TB, 1), lambda i: (i, 0)),
            pl.BlockSpec((OBS_DIM, ACT_DIM + 1), lambda i: (0, 0)),
        ],
        out_specs=pl.BlockSpec((TB, _OUT_W), lambda i: (i, 0)),
        compiler_params=pltpu.CompilerParams(
            dimension_semantics=("parallel",)),   # batch tiles split across v7x's 2 TCs
    )(obs2, act2, fused_tab)

    # Unpack the lane-packed slab outside the kernel.
    logits = out[:, :ACT_DIM]
    v = out[:, _V_COL]
    logp_a = out[:, _LOGP_COL]
    return logits, v, logp_a


if __name__ == "__main__":
    key = jax.random.PRNGKey(0)
    k_obs, k_act, k_pi, k_v = jax.random.split(key, 4)

    # Module init is zeros_(v_matrix); use nonzero values here purely to exercise
    # the fused value-gather path in the test (forward semantics are unchanged).
    v_matrix = jax.random.normal(k_v, (OBS_DIM,), dtype=jnp.float32)
    pi_logit_matrix = jax.random.uniform(
        k_pi, (OBS_DIM, ACT_DIM), minval=-1.0, maxval=1.0, dtype=jnp.float32)

    # Discrete observations / actions
    obs = jax.random.randint(k_obs, (B,), 0, OBS_DIM, dtype=jnp.int32)
    act = jax.random.randint(k_act, (B,), 0, ACT_DIM, dtype=jnp.int32)

    logits, v, logp_a = state_actor_critic_forward(obs, act, v_matrix, pi_logit_matrix)
    jax.block_until_ready((logits, v, logp_a))

    # Pure-JAX reference for sanity
    raw_ref = pi_logit_matrix[obs]                       # (B, ACT_DIM)
    logits_ref = jax.nn.log_softmax(raw_ref, axis=-1)
    v_ref = v_matrix[obs]
    logp_ref = logits_ref[jnp.arange(B), act]

    assert jnp.allclose(logits, logits_ref, atol=1e-5)
    assert jnp.allclose(v, v_ref, atol=1e-5)
    assert jnp.allclose(logp_a, logp_ref, atol=1e-5)

    print("KERNEL_OK")
</pallas_src>

<mosaic_0001>
module attributes {stable_mosaic.version = 11 : i64} {
  func.func @_sac_kernel(%arg0: i32, %arg1: memref<128x1xi32, #tpu.memory_space<vmem>>, %arg2: memref<128x1xi32, #tpu.memory_space<vmem>>, %arg3: memref<16x9xf32, #tpu.memory_space<vmem>>, %arg4: memref<128x10xf32, #tpu.memory_space<vmem>>) attributes {dimension_semantics = [#tpu.dimension_semantics<parallel>], iteration_bounds = array<i64: 2>, scalar_prefetch = 0 : i64, scratch_operands = 0 : i64, tpu.core_type = #tpu.core_type<tc>, window_params = [{transform_indices = @transform_0, window_bounds = array<i64: 128, 1>}, {transform_indices = @transform_1, window_bounds = array<i64: 128, 1>}, {pipeline_mode = #tpu.pipeline_mode<synchronous>, transform_indices = @transform_2, window_bounds = array<i64: 16, 9>}, {transform_indices = @transform_3, window_bounds = array<i64: 128, 10>}]} {
    %c0 = arith.constant 0 : index
    %c0_0 = arith.constant 0 : index
    %0 = vector.load %arg1[%c0, %c0_0] : memref<128x1xi32, #tpu.memory_space<vmem>>, vector<128x1xi32>
    %c0_1 = arith.constant 0 : index
    %c0_2 = arith.constant 0 : index
    %1 = vector.load %arg2[%c0_1, %c0_2] : memref<128x1xi32, #tpu.memory_space<vmem>>, vector<128x1xi32>
    %2 = tpu.iota {dimensions = array<i32: 1>} : vector<128x16xi32>
    %3 = vector.broadcast %0 : vector<128x1xi32> to vector<128x16xi32>
    %4 = arith.cmpi eq, %3, %2 : vector<128x16xi32>
    %5 = arith.extui %4 : vector<128x16xi1> to vector<128x16xi32>
    %6 = arith.sitofp %5 : vector<128x16xi32> to vector<128x16xf32>
    %c0_3 = arith.constant 0 : index
    %c0_4 = arith.constant 0 : index
    %7 = vector.load %arg3[%c0_3, %c0_4] : memref<16x9xf32, #tpu.memory_space<vmem>>, vector<16x9xf32>
    %cst = arith.constant dense<0.000000e+00> : vector<128x9xf32>
    %8 = tpu.matmul %6, %7, %cst {dimension_numbers = #tpu.dot_dimension_numbers<[1], [0], [0], [1], [0, 0, 1, 1], [], []>} : vector<128x16xf32>, vector<16x9xf32>, vector<128x9xf32> -> vector<128x9xf32>
    %9 = vector.extract_strided_slice %8 {offsets = [0, 0], sizes = [128, 8], strides = [1, 1]} : vector<128x9xf32> to vector<128x8xf32>
    %10 = vector.extract_strided_slice %8 {offsets = [0, 8], sizes = [128, 1], strides = [1, 1]} : vector<128x9xf32> to vector<128x1xf32>
    %cst_5 = arith.constant dense<0xFF800000> : vector<128xf32>
    %11 = vector.multi_reduction <maximumf>, %9, %cst_5 [1] : vector<128x8xf32> to vector<128xf32>
    %12 = vector.shape_cast %11 : vector<128xf32> to vector<128x1xf32>
    %13 = vector.broadcast %12 : vector<128x1xf32> to vector<128x8xf32>
    %14 = arith.subf %9, %13 : vector<128x8xf32>
    %15 = math.exp %14 : vector<128x8xf32>
    %cst_6 = arith.constant dense<0.000000e+00> : vector<128xf32>
    %16 = vector.multi_reduction <add>, %15, %cst_6 [1] : vector<128x8xf32> to vector<128xf32>
    %17 = vector.shape_cast %16 : vector<128xf32> to vector<128x1xf32>
    %18 = math.log %17 : vector<128x1xf32>
    %19 = vector.broadcast %18 : vector<128x1xf32> to vector<128x8xf32>
    %20 = arith.subf %14, %19 : vector<128x8xf32>
    %21 = tpu.iota {dimensions = array<i32: 1>} : vector<128x8xi32>
    %22 = vector.broadcast %1 : vector<128x1xi32> to vector<128x8xi32>
    %23 = arith.cmpi eq, %22, %21 : vector<128x8xi32>
    %cst_7 = arith.constant 0.000000e+00 : f32
    %24 = vector.broadcast %cst_7 : f32 to vector<128x8xf32>
    %25 = arith.select %23, %20, %24 : vector<128x8xi1>, vector<128x8xf32>
    %cst_8 = arith.constant dense<0.000000e+00> : vector<128xf32>
    %26 = vector.multi_reduction <add>, %25, %cst_8 [1] : vector<128x8xf32> to vector<128xf32>
    %27 = vector.shape_cast %26 : vector<128xf32> to vector<128x1xf32>
    %28 = tpu.concatenate %20, %10, %27 in 1 : vector<128x8xf32>, vector<128x1xf32>, vector<128x1xf32> -> vector<128x10xf32>
    %c0_9 = arith.constant 0 : index
    %c0_10 = arith.constant 0 : index
    %29 = vector.load %arg4[%c0_9, %c0_10] : memref<128x10xf32, #tpu.memory_space<vmem>>, vector<128x10xf32>
    tpu.vector_store %arg4[%c0_9, %c0_10], %28 {strides = array<i32>} : memref<128x10xf32, #tpu.memory_space<vmem>>, vector<128x10xf32>,
    return
  }
  func.func @transform_0(%arg0: i32) -> (i32, i32) {
    %c0_i32 = arith.constant 0 : i32
    %c0_i32_0 = arith.constant 0 : i32
    return %arg0, %c0_i32 : i32, i32
  }
  func.func @transform_1(%arg0: i32) -> (i32, i32) {
    %c0_i32 = arith.constant 0 : i32
    %c0_i32_0 = arith.constant 0 : i32
    return %arg0, %c0_i32 : i32, i32
  }
  func.func @transform_2(%arg0: i32) -> (i32, i32) {
    %c0_i32 = arith.constant 0 : i32
    %c0_i32_0 = arith.constant 0 : i32
    %c0_i32_1 = arith.constant 0 : i32
    return %c0_i32, %c0_i32_0 : i32, i32
  }
  func.func @transform_3(%arg0: i32) -> (i32, i32) {
    %c0_i32 = arith.constant 0 : i32
    %c0_i32_0 = arith.constant 0 : i32
    return %arg0, %c0_i32 : i32, i32
  }
}

</mosaic_0001>

<bundles_post_ra>
// kernel: tpu_custom_call.1
= control target key start
LH: loop header
LB: loop body
LE: loop exit
PB: predicated region body
PF: predicated region fallthrough
CT: control target
= control target key end

     0   :  { %s1164_s12 = smov 0   ;;  %s1602_s0 = inlined_call_operand.vmem [shape: s32[256,1], index: 0, kind: input, shape index: {}]   ;;  %s1603_s1 = inlined_call_operand.vmem [shape: s32[256,1], index: 1, kind: input, shape index: {}]   ;;  %s1604_s2 = inlined_call_operand.vmem [shape: f32[16,9], index: 2, kind: input, shape index: {}]   ;;  %s1605_s3 = inlined_call_operand.vmem [shape: f32[256,10], index: 3, kind: output, shape index: {}]  }
   0x1 LB: > { %s961_s13 = sadd.s32 4294967295, %s1140_s12   ;;  %p965_p0 = scmp.ge.s32.totalorder %s1140_s12, 1  ;;  %s1140_s12 = sphi %s1164_s12, %s13_s12  }
   0x2   : > { %p149_p1 = scmp.lt.s32.totalorder %s1140_s12, 3 }
   0x4   : > { %p150_p2 = pnand %p965_p0, %p149_p1 }
   0x5   : > { %s966_s14 = sshll.u32 (!%p150_p2), %s961_s13, 4  ;;  %v326_v0 = vld [vmem:[%s1604_s2] sm:$0xff] (!%p150_p2)  ;;  %v327_v1 = vld [vmem:[%s1604_s2 + $0x8] sm:$0xff] (!%p150_p2)  ;;  %v1142_v2 = vmov (!%p150_p2), 0   ;;  %v228_v32 = vlaneseq (!%p150_p2)  ;;  %vm328_vm0 = vcmask (!%p150_p2), 130048   ;;  %v1143_v36 = vmov (!%p150_p2), 0.0  }
   0x6   : > { %153 = sbr.rel (%p150_p2) target bundleno = 862 (0x35e), region = 32  ;;  %1069 = vset.pattern.permute.xlu1 (!%p150_p2), %v1142_v2  ;;  %1068 = vset.pattern.permute.xlu0 (!%p150_p2), %v1142_v2  ;;  %p179_p3 = scmp.lt.s32.totalorder (!%p150_p2), %s966_s14, 31  ;;  %v1052_v3 = vpack.c.bf16 (!%p150_p2), %v327_v1, %v326_v0 }
   0x7   : > { %v1202_v33 = vand.u32 (!%p150_p2), 127, %v228_v32 }
   0x8   : > { %1053 = vmatprep.subr.bf16.mxu0 (!%p150_p2), %v1052_v3  ;;  %1056 = vmatprep.subr.bf16.mxu1 (!%p150_p2), %v1052_v3 }
   0x9   : > { %1055 = vmatpush3.bf16.msra.mxu0 (!%p150_p2), %v1052_v3  ;;  %1057 = vmatpush3.bf16.msra.mxu1 (!%p150_p2), %v1052_v3 }
   0xd   : > { %s1607_s14 = smov (!%p179_p3, %s966_s14), 31 }
   0xe   : > { %s1178_s19 = sshll.u32 %s1607_s14, 3 }
   0xf   : > { %s182_s22 = scalar_lea.vmem %s1602_s0, %s1178_s19  ;;  %s1188_s25 = scalar_lea.vmem %s1603_s1, %s1178_s19 }
  0x10   : > { %v197_v4 = vld [vmem:[%s182_s22 + $0x8] sm:$0xff]  ;;  %v196_v5 = vld [vmem:[%s182_s22] sm:$0xff]  ;;  %v206_v8 = vld [vmem:[%s182_s22 + $0x50] sm:$0xff]  ;;  %s1536_s28 = scalar_lea.vmem %s1605_s3, %s1178_s19 }
  0x11   : > { %234 = vperm.xlu1 %1069, %v197_v4   ;;  %231 = vperm.xlu0 %1068, %v196_v5   ;;  %v205_v6 = vld [vmem:[%s182_s22 + $0x48] sm:$0xff]  ;;  %v204_v7 = vld [vmem:[%s182_s22 + $0x40] sm:$0xff]  ;;  %v198_v9 = vld [vmem:[%s182_s22 + $0x10] sm:$0xff] }
  0x12   : > { %v207_v10 = vld [vmem:[%s182_s22 + $0x58] sm:$0xff]  ;;  %v208_v12 = vld [vmem:[%s182_s22 + $0x60] sm:$0xff]  ;;  %v209_v14 = vld [vmem:[%s182_s22 + $0x68] sm:$0xff] }
  0x13   : > { %v199_v11 = vld [vmem:[%s182_s22 + $0x18] sm:$0xff]  ;;  %v200_v13 = vld [vmem:[%s182_s22 + $0x20] sm:$0xff]  ;;  %v201_v15 = vld [vmem:[%s182_s22 + $0x28] sm:$0xff] }
  0x14   : > { %v210_v16 = vld [vmem:[%s182_s22 + $0x70] sm:$0xff]  ;;  %v211_v18 = vld [vmem:[%s182_s22 + $0x78] sm:$0xff]  ;;  %v212_v20 = vld [vmem:[%s1188_s25] sm:$0xff] }
  0x15   : > { %258 = vperm.xlu1 %1069, %v205_v6   ;;  %255 = vperm.xlu0 %1068, %v204_v7   ;;  %v202_v17 = vld [vmem:[%s182_s22 + $0x30] sm:$0xff]  ;;  %v203_v19 = vld [vmem:[%s182_s22 + $0x38] sm:$0xff]  ;;  %v213_v21 = vld [vmem:[%s1188_s25 + $0x8] sm:$0xff] }
  0x16   : > { %v214_v22 = vld [vmem:[%s1188_s25 + $0x10] sm:$0xff]  ;;  %v216_v23 = vld [vmem:[%s1188_s25 + $0x20] sm:$0xff]  ;;  %v215_v24 = vld [vmem:[%s1188_s25 + $0x18] sm:$0xff] }
  0x17   : > { %v218_v25 = vld [vmem:[%s1188_s25 + $0x30] sm:$0xff]  ;;  %v217_v26 = vld [vmem:[%s1188_s25 + $0x28] sm:$0xff]  ;;  %v220_v27 = vld [vmem:[%s1188_s25 + $0x40] sm:$0xff] }
  0x18   : > { %v219_v28 = vld [vmem:[%s1188_s25 + $0x38] sm:$0xff]  ;;  %v222_v29 = vld [vmem:[%s1188_s25 + $0x50] sm:$0xff]  ;;  %v221_v30 = vld [vmem:[%s1188_s25 + $0x48] sm:$0xff] }
  0x19   : > { %261 = vperm.xlu1 %1069, %v206_v8   ;;  %237 = vperm.xlu0 %1068, %v198_v9   ;;  %v223_v31 = vld [vmem:[%s1188_s25 + $0x58] sm:$0xff] }
  0x1d   : > { %264 = vperm.xlu1 %1069, %v207_v10   ;;  %240 = vperm.xlu0 %1068, %v199_v11  }
  0x21   : > { %267 = vperm.xlu1 %1069, %v208_v12   ;;  %243 = vperm.xlu0 %1068, %v200_v13  }
  0x25   : > { %270 = vperm.xlu1 %1069, %v209_v14   ;;  %246 = vperm.xlu0 %1068, %v201_v15  }
  0x29   : > { %273 = vperm.xlu1 %1069, %v210_v16   ;;  %249 = vperm.xlu0 %1068, %v202_v17  }
  0x2d   : > { %276 = vperm.xlu1 %1069, %v211_v18   ;;  %252 = vperm.xlu0 %1068, %v203_v19  }
  0x31   : > { %716 = vperm.xlu1 %1069, %v212_v20   ;;  %719 = vperm.xlu0 %1068, %v213_v21  }
  0x35   : > { %722 = vperm.xlu1 %1069, %v214_v22   ;;  %728 = vperm.xlu0 %1068, %v216_v23  }
  0x39   : > { %725 = vperm.xlu1 %1069, %v215_v24   ;;  %734 = vperm.xlu0 %1068, %v218_v25  }
  0x3d   : > { %731 = vperm.xlu1 %1069, %v217_v26   ;;  %740 = vperm.xlu0 %1068, %v220_v27  }
  0x41   : > { %737 = vperm.xlu1 %1069, %v219_v28   ;;  %746 = vperm.xlu0 %1068, %v222_v29  }
  0x45   : > { %743 = vperm.xlu1 %1069, %v221_v30  }
  0x49   : > { %749 = vperm.xlu1 %1069, %v223_v31  }
  0x90   : > { %v235_v34 = vpop.permute.xlu1 %234  ;;  %v232_v35 = vpop.permute.xlu0 %231 }
  0x91   : > { %vm279_vm1 = vcmp.eq.s32.totalorder %v235_v34, %v1202_v33  ;;  %vm278_vm2 = vcmp.eq.s32.totalorder %v232_v35, %v1202_v33 }
  0x92   : > { %v973_v37 = vsel %vm279_vm1, 1.0, %v1143_v36  ;;  %v972_v38 = vsel %vm278_vm2, 1.0, %v1143_v36  ;;  %vm522_vm2 = vcmask 64512  }
  0x93   : > { %1028 = vmatprep.mubr.msk.f32.mxu0 %vm328_vm0, %v972_v38 }
  0x94   : > { %v259_v39 = vpop.permute.xlu1 %258  ;;  %1029 = vmatmul.mubr.msk.f32.vlgmr.msra.gmra.mrb[0].mxu0 %vm328_vm0, %v973_v37  ;;  %v256_v40 = vpop.permute.xlu0 %255  ;;  %v224_v37 = vld [vmem:[%s1188_s25 + $0x60] sm:$0xff] }
  0x95   : > { %vm287_vm3 = vcmp.eq.s32.totalorder %v259_v39, %v1202_v33  ;;  %vm286_vm4 = vcmp.eq.s32.totalorder %v256_v40, %v1202_v33 }
  0x96   : > { %v981_v41 = vsel %vm287_vm3, 1.0, %v1143_v36  ;;  %v980_v42 = vsel %vm286_vm4, 1.0, %v1143_v36 }
  0x97   : > { %1040 = vmatprep.mubr.msk.f32.mxu1 %vm328_vm0, %v980_v42 }
  0x98   : > { %v262_v43 = vpop.permute.xlu1 %261  ;;  %1041 = vmatmul.mubr.msk.f32.vlgmr.msra.gmra.mrb[0].mxu1 %vm328_vm0, %v981_v41  ;;  %v238_v44 = vpop.permute.xlu0 %237 }
  0x99   : > { %vm288_vm5 = vcmp.eq.s32.totalorder %v262_v43, %v1202_v33  ;;  %vm280_vm6 = vcmp.eq.s32.totalorder %v238_v44, %v1202_v33 }
  0x9a   : > { %v982_v45 = vsel %vm288_vm5, 1.0, %v1143_v36  ;;  %v974_v46 = vsel %vm280_vm6, 1.0, %v1143_v36 }
  0x9b   : > { %1031 = vmatprep.mubr.msk.f32.mxu0 %vm328_vm0, %v974_v46  ;;  %1043 = vmatprep.mubr.msk.f32.mxu1 %vm328_vm0, %v982_v45 }
  0x9c   : > { %v265_v47 = vpop.permute.xlu1 %264  ;;  %v241_v48 = vpop.permute.xlu0 %240 }
  0x9d   : > { %vm289_vm7 = vcmp.eq.s32.totalorder %v265_v47, %v1202_v33  ;;  %vm281_vm8 = vcmp.eq.s32.totalorder %v241_v48, %v1202_v33 }
  0x9e   : > { %v983_v49 = vsel %vm289_vm7, 1.0, %v1143_v36  ;;  %v975_v50 = vsel %vm281_vm8, 1.0, %v1143_v36 }
  0x9f   : > { %1032 = vmatmul.mubr.msk.f32.gmra.mrb[2].mxu0 %vm328_vm0, %v975_v50  ;;  %1044 = vmatmul.mubr.msk.f32.gmra.mrb[2].mxu1 %vm328_vm0, %v983_v49 }
  0xa0   : > { %v268_v51 = vpop.permute.xlu1 %267  ;;  %v244_v52 = vpop.permute.xlu0 %243 }
  0xa1   : > { %vm290_vm9 = vcmp.eq.s32.totalorder %v268_v51, %v1202_v33  ;;  %vm282_vm10 = vcmp.eq.s32.totalorder %v244_v52, %v1202_v33 }
  0xa2   : > { %v984_v53 = vsel %vm290_vm9, 1.0, %v1143_v36  ;;  %v976_v54 = vsel %vm282_vm10, 1.0, %v1143_v36 }
  0xa3   : > { %1034 = vmatprep.mubr.msk.f32.mxu0 %vm328_vm0, %v976_v54  ;;  %1046 = vmatprep.mubr.msk.f32.mxu1 %vm328_vm0, %v984_v53 }
  0xa4   : > { %v271_v55 = vpop.permute.xlu1 %270  ;;  %v247_v56 = vpop.permute.xlu0 %246 }
  0xa5   : > { %vm291_vm11 = vcmp.eq.s32.totalorder %v271_v55, %v1202_v33  ;;  %vm283_vm12 = vcmp.eq.s32.totalorder %v247_v56, %v1202_v33 }
  0xa6   : > { %v985_v57 = vsel %vm291_vm11, 1.0, %v1143_v36  ;;  %v977_v58 = vsel %vm283_vm12, 1.0, %v1143_v36 }
  0xa7   : > { %1035 = vmatmul.mubr.msk.f32.gmra.mrb[4].mxu0 %vm328_vm0, %v977_v58  ;;  %1047 = vmatmul.mubr.msk.f32.gmra.mrb[4].mxu1 %vm328_vm0, %v985_v57 }
  0xa8   : > { %v274_v59 = vpop.permute.xlu1 %273  ;;  %v250_v60 = vpop.permute.xlu0 %249 }
  0xa9   : > { %vm292_vm13 = vcmp.eq.s32.totalorder %v274_v59, %v1202_v33  ;;  %vm284_vm14 = vcmp.eq.s32.totalorder %v250_v60, %v1202_v33 }
  0xaa   : > { %v986_v61 = vsel %vm292_vm13, 1.0, %v1143_v36  ;;  %v978_v62 = vsel %vm284_vm14, 1.0, %v1143_v36 }
  0xab   : > { %1037 = vmatprep.mubr.msk.f32.mxu0 %vm328_vm0, %v978_v62  ;;  %1049 = vmatprep.mubr.msk.f32.mxu1 %vm328_vm0, %v986_v61 }
  0xac   : > { %v277_v63 = vpop.permute.xlu1 %276  ;;  %v253_v0 = vpop.permute.xlu0 %252 }
  0xad   : > { %vm293_vm15 = vcmp.eq.s32.totalorder %v277_v63, %v1202_v33  ;;  %vm285_vm1 = vcmp.eq.s32.totalorder %v253_v0, %v1202_v33 }
  0xae   : > { %v987_v1 = vsel %vm293_vm15, 1.0, %v1143_v36  ;;  %v979_v2 = vsel %vm285_vm1, 1.0, %v1143_v36  ;;  %v225_v36 = vld [vmem:[%s1188_s25 + $0x68] sm:$0xff] }
  0xaf   : > { %1038 = vmatmul.mubr.msk.f32.gmra.mrb[6].mxu0 %vm328_vm0, %v979_v2  ;;  %1050 = vmatmul.mubr.msk.f32.gmra.mrb[6].mxu1 %vm328_vm0, %v987_v1 }
  0xb0   : > { %v1302_v38 = vpop.permute.xlu1 %716  ;;  %v1308_v41 = vpop.permute.xlu0 %719 }
  0xb1   : > { %vm764_vm0 = vcmp.eq.s32.totalorder %v1308_v41, %v1202_v33  ;;  %vm763_vm4 = vcmp.eq.s32.totalorder %v1302_v38, %v1202_v33 }
  0xb4   : > { %v1304_v39 = vpop.permute.xlu1 %722  ;;  %v1312_v43 = vpop.permute.xlu0 %728 }
  0xb5   : > { %vm765_vm8 = vcmp.eq.s32.totalorder %v1304_v39, %v1202_v33  ;;  %vm767_vm11 = vcmp.eq.s32.totalorder %v1312_v43, %v1202_v33 }
  0xb8   : > { %v1306_v40 = vpop.permute.xlu1 %725  ;;  %v1316_v45 = vpop.permute.xlu0 %734 }
  0xb9   : > { %vm766_vm6 = vcmp.eq.s32.totalorder %v1306_v40, %v1202_v33  ;;  %vm769_vm15 = vcmp.eq.s32.totalorder %v1316_v45, %v1202_v33 }
  0xbc   : > { %v1310_v42 = vpop.permute.xlu1 %731  ;;  %v1320_v47 = vpop.permute.xlu0 %740 }
  0xbd   : > { %vm771_vm5 = vcmp.eq.s32.totalorder %v1320_v47, %v1202_v33  ;;  %vm768_vm10 = vcmp.eq.s32.totalorder %v1310_v42, %v1202_v33 }
  0xc0   : > { %v1314_v44 = vpop.permute.xlu1 %737  ;;  %v1324_v49 = vpop.permute.xlu0 %746 }
  0xc1   : > { %vm773_vm9 = vcmp.eq.s32.totalorder %v1324_v49, %v1202_v33  ;;  %vm770_vm14 = vcmp.eq.s32.totalorder %v1314_v44, %v1202_v33 }
  0xc4   : > { %v1318_v46 = vpop.permute.xlu1 %743 }
  0xc5   : > { %vm772_vm3 = vcmp.eq.s32.totalorder %v1318_v46, %v1202_v33 }
  0xc8   : > { %v1322_v48 = vpop.permute.xlu1 %749 }
  0xc9   : > { %vm774_vm7 = vcmp.eq.s32.totalorder %v1322_v48, %v1202_v33 }
 0x167   : > { %v1236_v3 = vpop.f32.mrb[0].mxu0 }
 0x168   : > { %v1238_v4 = vpop.f32.mrb[1].mxu0  ;;  %v526_v5 = vsel %vm522_vm2, %v1236_v3, -inf }
 0x169   : > { %527 = vmax.xlane.f32.xlu1 %v526_v5  ;;  %v523_v10 = vsel %vm522_vm2, %v1238_v4, -inf }
 0x16b   : > { %v1242_v6 = vpop.f32.mrb[0].mxu1 }
 0x16c   : > { %v1244_v7 = vpop.f32.mrb[1].mxu1  ;;  %v550_v8 = vsel %vm522_vm2, %v1242_v6, -inf }
 0x16d   : > { %551 = vmax.xlane.f32.xlu0 %v550_v8  ;;  %v547_v9 = vsel %vm522_vm2, %v1244_v7, -inf }
 0x16e   : > { %548 = vmax.xlane.f32.xlu1 %v547_v9 }
 0x171   : > { %524 = vmax.xlane.f32.xlu0 %v523_v10 }
 0x172   : > { %v1252_v11 = vpop.f32.mrb[2].mxu0  ;;  %v1254_v12 = vpop.f32.mrb[2].mxu1 }
 0x173   : > { %v1256_v13 = vpop.f32.mrb[3].mxu0  ;;  %v1258_v14 = vpop.f32.mrb[3].mxu1  ;;  %v532_v15 = vsel %vm522_vm2, %v1252_v11, -inf  ;;  %v556_v17 = vsel %vm522_vm2, %v1254_v12, -inf }
 0x174   : > { %v553_v16 = vsel %vm522_vm2, %v1258_v14, -inf  ;;  %v529_v22 = vsel %vm522_vm2, %v1256_v13, -inf }
 0x175   : > { %554 = vmax.xlane.f32.xlu1 %v553_v16  ;;  %533 = vmax.xlane.f32.xlu0 %v532_v15 }
 0x179   : > { %557 = vmax.xlane.f32.xlu0 %v556_v17 }
 0x17a   : > { %v1266_v18 = vpop.f32.mrb[4].mxu0  ;;  %v1268_v19 = vpop.f32.mrb[4].mxu1 }
 0x17b   : > { %v1270_v20 = vpop.f32.mrb[5].mxu0  ;;  %v1272_v21 = vpop.f32.mrb[5].mxu1  ;;  %v538_v24 = vsel %vm522_vm2, %v1266_v18, -inf  ;;  %v562_v30 = vsel %vm522_vm2, %v1268_v19, -inf }
 0x17c   : > { %v535_v23 = vsel %vm522_vm2, %v1270_v20, -inf  ;;  %v559_v25 = vsel %vm522_vm2, %v1272_v21, -inf }
 0x17d   : > { %530 = vmax.xlane.f32.xlu0 %v529_v22  ;;  %536 = vmax.xlane.f32.xlu1 %v535_v23 }
 0x181   : > { %539 = vmax.xlane.f32.xlu0 %v538_v24  ;;  %560 = vmax.xlane.f32.xlu1 %v559_v25 }
 0x182   : > { %v1282_v26 = vpop.f32.mrb[6].mxu0  ;;  %v1284_v27 = vpop.f32.mrb[6].mxu1 }
 0x183   : > { %v1286_v28 = vpop.f32.mrb[7].mxu0  ;;  %v1288_v29 = vpop.f32.mrb[7].mxu1  ;;  %v544_v32 = vsel %vm522_vm2, %v1282_v26, -inf  ;;  %v568_v35 = vsel %vm522_vm2, %v1284_v27, -inf }
 0x184   : > { %v541_v31 = vsel %vm522_vm2, %v1286_v28, -inf  ;;  %v565_v34 = vsel %vm522_vm2, %v1288_v29, -inf }
 0x185   : > { %563 = vmax.xlane.f32.xlu0 %v562_v30  ;;  %542 = vmax.xlane.f32.xlu1 %v541_v31 }
 0x189   : > { %545 = vmax.xlane.f32.xlu0 %v544_v32  ;;  %566 = vmax.xlane.f32.xlu1 %v565_v34 }
 0x18d   : > { %569 = vmax.xlane.f32.xlu0 %v568_v35 }
 0x19a   : > { %755 = vperm.xlu1 %1069, %v225_v36  }
 0x1a3   : > { %752 = vperm.xlu0 %1068, %v224_v37  }
 0x1f6   : > { %v528_v50 = vpop.xlane.xlu1 %527 }
 0x1f7   : > { %v1327_v51 = vsub.f32 %v1236_v3, %v528_v50 }
 0x1f9   : > { %v589_v52 = vmul.f32 1.442695, %v1327_v51 }
 0x1fa   : > { %v552_v53 = vpop.xlane.xlu0 %551 }
 0x1fb   : > { %1070 = vpow2.f32 %v589_v52  ;;  %v1331_v54 = vsub.f32 %v1242_v6, %v552_v53  ;;  %v549_v55 = vpop.xlane.xlu1 %548 }
 0x1fc   : > { %v1335_v57 = vsub.f32 %v1244_v7, %v549_v55 }
 0x1fd   : > { %v605_v56 = vmul.f32 1.442695, %v1331_v54 }
 0x1fe   : > { %v525_v58 = vpop.xlane.xlu0 %524  ;;  %v603_v60 = vmul.f32 1.442695, %v1335_v57 }
 0x1ff   : > { %1072 = vpow2.f32 %v605_v56  ;;  %v1338_v59 = vsub.f32 %v1238_v4, %v525_v58 }
 0x201   : > { %v587_v61 = vmul.f32 1.442695, %v1338_v59 }
 0x202   : > { %v534_v62 = vpop.xlane.xlu0 %533  ;;  %v555_v2 = vpop.xlane.xlu1 %554 }
 0x203   : > { %1074 = vpow2.f32 %v587_v61  ;;  %v1343_v63 = vsub.f32 %v1252_v11, %v534_v62  ;;  %v1352_v16 = vsub.f32 %v1258_v14, %v555_v2 }
 0x204   : > { %1076 = vpow2.f32 %v603_v60 }
 0x205   : > { %v1071_v0 = vpop.eup %1070  ;;  %v593_v1 = vmul.f32 1.442695, %v1343_v63  ;;  %v607_v31 = vmul.f32 1.442695, %v1352_v16 }
 0x206   : > { %v558_v5 = vpop.xlane.xlu0 %557  ;;  %v622_v8 = vsel %vm522_vm2, %v1071_v0, 0.0 }
 0x207   : > { %v1348_v9 = vsub.f32 %v1254_v12, %v558_v5  ;;  %623 = vadd.xlane.f32.xlu0 %v622_v8  ;;  %1078 = vpow2.f32 %v593_v1 }
 0x209   : > { %v1073_v10 = vpop.eup %1072  ;;  %v609_v15 = vmul.f32 1.442695, %v1348_v9 }
 0x20a   : > { %v537_v17 = vpop.xlane.xlu1 %536  ;;  %v531_v22 = vpop.xlane.xlu0 %530  ;;  %v646_v23 = vsel %vm522_vm2, %v1073_v10, 0.0 }
 0x20b   : > { %1080 = vpow2.f32 %v609_v15  ;;  %v1356_v24 = vsub.f32 %v1256_v13, %v531_v22  ;;  %647 = vadd.xlane.f32.xlu0 %v646_v23  ;;  %v1361_v32 = vsub.f32 %v1270_v20, %v537_v17 }
 0x20d   : > { %v1075_v25 = vpop.eup %1074  ;;  %v591_v30 = vmul.f32 1.442695, %v1356_v24  ;;  %v595_v55 = vmul.f32 1.442695, %v1361_v32 }
 0x20e   : > { %v561_v34 = vpop.xlane.xlu1 %560  ;;  %v540_v35 = vpop.xlane.xlu0 %539  ;;  %v619_v36 = vsel %vm522_vm2, %v1075_v25, 0.0 }
 0x20f   : > { %v1077_v37 = vpop.eup %1076  ;;  %v1365_v50 = vsub.f32 %v1266_v18, %v540_v35  ;;  %620 = vadd.xlane.f32.xlu1 %v619_v36  ;;  %1082 = vpow2.f32 %v591_v30  ;;  %v1370_v56 = vsub.f32 %v1272_v21, %v561_v34 }
 0x210   : > { %1084 = vpow2.f32 %v607_v31  ;;  %v643_v61 = vsel %vm522_vm2, %v1077_v37, 0.0 }
 0x211   : > { %v597_v52 = vmul.f32 1.442695, %v1365_v50  ;;  %v1079_v53 = vpop.eup %1078  ;;  %v611_v5 = vmul.f32 1.442695, %v1370_v56 }
 0x212   : > { %v543_v58 = vpop.xlane.xlu1 %542  ;;  %v564_v60 = vpop.xlane.xlu0 %563  ;;  %v628_v0 = vsel %vm522_vm2, %v1079_v53, 0.0 }
 0x213   : > { %v1374_v62 = vsub.f32 %v1268_v19, %v564_v60  ;;  %644 = vadd.xlane.f32.xlu1 %v643_v61  ;;  %1086 = vpow2.f32 %v597_v52  ;;  %629 = vadd.xlane.f32.xlu0 %v628_v0  ;;  %v1380_v8 = vsub.f32 %v1286_v28, %v543_v58 }
 0x214   : > { %1088 = vpow2.f32 %v595_v55 }
 0x215   : > { %v1081_v1 = vpop.eup %1080  ;;  %v613_v2 = vmul.f32 1.442695, %v1374_v62  ;;  %v599_v30 = vmul.f32 1.442695, %v1380_v8 }
 0x216   : > { %v546_v10 = vpop.xlane.xlu0 %545  ;;  %v652_v15 = vsel %vm522_vm2, %v1081_v1, 0.0  ;;  %v567_v17 = vpop.xlane.xlu1 %566 }
 0x217   : > { %v1384_v22 = vsub.f32 %v1282_v26, %v546_v10  ;;  %1090 = vpow2.f32 %v613_v2  ;;  %653 = vadd.xlane.f32.xlu0 %v652_v15  ;;  %v1389_v31 = vsub.f32 %v1288_v29, %v567_v17 }
 0x218   : > { %1092 = vpow2.f32 %v611_v5 }
 0x219   : > { %v601_v23 = vmul.f32 1.442695, %v1384_v22  ;;  %v1083_v25 = vpop.eup %1082  ;;  %v615_v55 = vmul.f32 1.442695, %v1389_v31 }
 0x21a   : > { %v570_v34 = vpop.xlane.xlu0 %569  ;;  %v625_v36 = vsel %vm522_vm2, %v1083_v25, 0.0  ;;  %v1085_v37 = vpop.eup %1084 }
 0x21b   : > { %v1392_v35 = vsub.f32 %v1284_v27, %v570_v34  ;;  %1094 = vpow2.f32 %v601_v23  ;;  %626 = vadd.xlane.f32.xlu1 %v625_v36  ;;  %v649_v58 = vsel %vm522_vm2, %v1085_v37, 0.0 }
 0x21c   : > { %1096 = vpow2.f32 %v599_v30 }
 0x21d   : > { %v617_v52 = vmul.f32 1.442695, %v1392_v35  ;;  %v1087_v53 = vpop.eup %1086 }
 0x21e   : > { %v634_v60 = vsel %vm522_vm2, %v1087_v53, 0.0  ;;  %v1089_v61 = vpop.eup %1088  ;;  %v226_v53 = vld [vmem:[%s1188_s25 + $0x70] sm:$0xff] }
 0x21f   : > { %1098 = vpow2.f32 %v617_v52  ;;  %650 = vadd.xlane.f32.xlu1 %v649_v58  ;;  %635 = vadd.xlane.f32.xlu0 %v634_v60  ;;  %v631_v1 = vsel %vm522_vm2, %v1089_v61, 0.0  ;;  %v227_v52 = vld [vmem:[%s1188_s25 + $0x78] sm:$0xff]  ;;  %v1410_v60 = vpop.permute.xlu1 %755 }
 0x220   : > { %1100 = vpow2.f32 %v615_v55  ;;  %vm776_vm12 = vcmp.eq.s32.totalorder %v1410_v60, %v1202_v33 }
 0x221   : > { %v1091_v0 = vpop.eup %1090 }
 0x222   : > { %v658_v2 = vsel %vm522_vm2, %v1091_v0, 0.0  ;;  %v1093_v5 = vpop.eup %1092  ;;  %v1408_v55 = vpop.permute.xlu0 %752 }
 0x223   : > { %632 = vadd.xlane.f32.xlu1 %v631_v1  ;;  %659 = vadd.xlane.f32.xlu0 %v658_v2  ;;  %v655_v15 = vsel %vm522_vm2, %v1093_v5, 0.0  ;;  %vm775_vm13 = vcmp.eq.s32.totalorder %v1408_v55, %v1202_v33 }
 0x225   : > { %v1095_v10 = vpop.eup %1094 }
 0x226   : > { %v640_v17 = vsel %vm522_vm2, %v1095_v10, 0.0  ;;  %v1097_v23 = vpop.eup %1096 }
 0x227   : > { %656 = vadd.xlane.f32.xlu1 %v655_v15  ;;  %641 = vadd.xlane.f32.xlu0 %v640_v17  ;;  %v637_v34 = vsel %vm522_vm2, %v1097_v23, 0.0 }
 0x229   : > { %v1099_v25 = vpop.eup %1098 }
 0x22a   : > { %v664_v30 = vsel %vm522_vm2, %v1099_v25, 0.0  ;;  %v1101_v36 = vpop.eup %1100 }
 0x22b   : > { %638 = vadd.xlane.f32.xlu1 %v637_v34  ;;  %665 = vadd.xlane.f32.xlu0 %v664_v30  ;;  %v661_v37 = vsel %vm522_vm2, %v1101_v36, 0.0 }
 0x22f   : > { %662 = vadd.xlane.f32.xlu1 %v661_v37 }
 0x240   : > { %761 = vperm.xlu1 %1069, %v227_v52  }
 0x241   : > { %758 = vperm.xlu0 %1068, %v226_v53  }
 0x294   : > { %v624_v58 = vpop.xlane.xlu0 %623 }
 0x295   : > { %1102 = vlog2.f32 %v624_v58 }
 0x298   : > { %v648_v61 = vpop.xlane.xlu0 %647 }
 0x299   : > { %1104 = vlog2.f32 %v648_v61 }
 0x29c   : > { %v621_v0 = vpop.xlane.xlu1 %620 }
 0x29d   : > { %1106 = vlog2.f32 %v621_v0 }
 0x29f   : > { %v1103_v1 = vpop.eup %1102 }
 0x2a0   : > { %v670_v2 = vmul.f32 0.6931472, %v1103_v1  ;;  %v645_v5 = vpop.xlane.xlu1 %644  ;;  %v630_v10 = vpop.xlane.xlu0 %629 }
 0x2a1   : > { %1108 = vlog2.f32 %v645_v5 }
 0x2a2   : > { %1110 = vlog2.f32 %v630_v10  ;;  %v700_v15 = vsub.f32 %v1327_v51, %v670_v2 }
 0x2a3   : > { %v1105_v17 = vpop.eup %1104 }
 0x2a4   : > { %v686_v23 = vmul.f32 0.6931472, %v1105_v17  ;;  %v780_v25 = vsel %vm764_vm0, %v700_v15, 0.0  ;;  %v1417_v30 = vsel %vm522_vm2, %v700_v15, %v1236_v3  ;;  %v654_v34 = vpop.xlane.xlu0 %653 }
 0x2a5   : > { %v798_v36 = vsel %vm522_vm2, %v780_v25, 0.0  ;;  %1112 = vlog2.f32 %v654_v34 }
 0x2a6   : > { %799 = vadd.xlane.f32.xlu1 %v798_v36  ;;  %v708_v37 = vsub.f32 %v1331_v54, %v686_v23 }
 0x2a7   : > { %v1107_v52 = vpop.eup %1106 }
 0x2a8   : > { %v668_v51 = vmul.f32 0.6931472, %v1107_v52  ;;  %v788_v53 = vsel %vm772_vm3, %v708_v37, 0.0  ;;  %v1425_v41 = vsel %vm522_vm2, %v708_v37, %v1242_v6  ;;  %v627_v58 = vpop.xlane.xlu1 %626  ;;  %vm859_vm3 = vcmask 72704  }
 0x2a9   : > { %v822_v3 = vsel %vm522_vm2, %v788_v53, 0.0  ;;  %1114 = vlog2.f32 %v627_v58 }
 0x2aa   : > { %823 = vadd.xlane.f32.xlu0 %v822_v3  ;;  %v699_v61 = vsub.f32 %v1338_v59, %v668_v51 }
 0x2ab   : > { %v1109_v0 = vpop.eup %1108 }
 0x2ac   : > { %v1111_v54 = vpop.eup %1110  ;;  %v684_v1 = vmul.f32 0.6931472, %v1109_v0  ;;  %v779_v46 = vsel %vm763_vm4, %v699_v61, 0.0  ;;  %v1433_v2 = vsel %vm522_vm2, %v699_v61, %v1238_v4  ;;  %v651_v5 = vpop.xlane.xlu1 %650  ;;  %vm876_vm4 = vcmask 80896  }
 0x2ad   : > { %v674_v6 = vmul.f32 0.6931472, %v1111_v54  ;;  %v636_v10 = vpop.xlane.xlu0 %635  ;;  %v795_v15 = vsel %vm522_vm2, %v779_v46, 0.0  ;;  %1116 = vlog2.f32 %v651_v5 }
 0x2ae   : > { %796 = vadd.xlane.f32.xlu0 %v795_v15  ;;  %v707_v59 = vsub.f32 %v1335_v57, %v684_v1  ;;  %1118 = vlog2.f32 %v636_v10 }
 0x2af   : > { %v702_v38 = vsub.f32 %v1343_v63, %v674_v6  ;;  %v1113_v17 = vpop.eup %1112 }
 0x2b0   : > { %v787_v4 = vsel %vm771_vm5, %v707_v59, 0.0  ;;  %v1444_v23 = vsel %vm522_vm2, %v707_v59, %v1244_v7  ;;  %v690_v25 = vmul.f32 0.6931472, %v1113_v17  ;;  %v633_v34 = vpop.xlane.xlu1 %632 }
 0x2b1   : > { %v660_v36 = vpop.xlane.xlu0 %659  ;;  %v819_v57 = vsel %vm522_vm2, %v787_v4, 0.0  ;;  %v782_v37 = vsel %vm766_vm6, %v702_v38, 0.0  ;;  %v1449_v47 = vsel %vm522_vm2, %v702_v38, %v1252_v11  ;;  %1120 = vlog2.f32 %v633_v34 }
 0x2b2   : > { %820 = vadd.xlane.f32.xlu1 %v819_v57  ;;  %v804_v63 = vsel %vm522_vm2, %v782_v37, 0.0  ;;  %1122 = vlog2.f32 %v660_v36  ;;  %v710_v40 = vsub.f32 %v1348_v9, %v690_v25 }
 0x2b3   : > { %805 = vadd.xlane.f32.xlu0 %v804_v63  ;;  %v1115_v7 = vpop.eup %1114 }
 0x2b4   : > { %v672_v52 = vmul.f32 0.6931472, %v1115_v7  ;;  %v657_v51 = vpop.xlane.xlu1 %656  ;;  %v790_v58 = vsel %vm774_vm7, %v710_v40, 0.0  ;;  %v1457_v11 = vsel %vm522_vm2, %v710_v40, %v1254_v12 }
 0x2b5   : > { %v642_v53 = vpop.xlane.xlu0 %641  ;;  %1124 = vlog2.f32 %v657_v51  ;;  %v828_v3 = vsel %vm522_vm2, %v790_v58, 0.0 }
 0x2b6   : > { %1126 = vlog2.f32 %v642_v53  ;;  %v701_v61 = vsub.f32 %v1356_v24, %v672_v52 }
 0x2b7   : > { %829 = vadd.xlane.f32.xlu0 %v828_v3  ;;  %v1117_v9 = vpop.eup %1116 }
 0x2b8   : > { %v1119_v48 = vpop.eup %1118  ;;  %v688_v0 = vmul.f32 0.6931472, %v1117_v9  ;;  %v639_v54 = vpop.xlane.xlu1 %638  ;;  %v781_v46 = vsel %vm765_vm8, %v701_v61, 0.0  ;;  %v1465_v12 = vsel %vm522_vm2, %v701_v61, %v1256_v13 }
 0x2b9   : > { %v666_v1 = vpop.xlane.xlu0 %665  ;;  %v678_v6 = vmul.f32 0.6931472, %v1119_v48  ;;  %1128 = vlog2.f32 %v639_v54  ;;  %v801_v5 = vsel %vm522_vm2, %v781_v46, 0.0 }
 0x2ba   : > { %1130 = vlog2.f32 %v666_v1  ;;  %v709_v24 = vsub.f32 %v1352_v16, %v688_v0 }
 0x2bb   : > { %802 = vadd.xlane.f32.xlu0 %v801_v5  ;;  %v1121_v10 = vpop.eup %1120  ;;  %v704_v39 = vsub.f32 %v1365_v50, %v678_v6 }
 0x2bc   : > { %v1123_v15 = vpop.eup %1122  ;;  %v676_v13 = vmul.f32 0.6931472, %v1121_v10  ;;  %v663_v59 = vpop.xlane.xlu1 %662  ;;  %v789_v38 = vsel %vm773_vm9, %v709_v24, 0.0  ;;  %v1476_v17 = vsel %vm522_vm2, %v709_v24, %v1258_v14 }
 0x2bd   : > { %v694_v4 = vmul.f32 0.6931472, %v1123_v15  ;;  %1132 = vlog2.f32 %v663_v59  ;;  %v825_v16 = vsel %vm522_vm2, %v789_v38, 0.0  ;;  %v784_v25 = vsel %vm768_vm10, %v704_v39, 0.0 }
 0x2be   : > { %826 = vadd.xlane.f32.xlu1 %v825_v16  ;;  %v810_v49 = vsel %vm522_vm2, %v784_v25, 0.0  ;;  %v703_v50 = vsub.f32 %v1361_v32, %v676_v13  ;;  %v1483_v42 = vsel %vm522_vm2, %v704_v39, %v1266_v18 }
 0x2bf   : > { %v1125_v34 = vpop.eup %1124  ;;  %811 = vadd.xlane.f32.xlu0 %v810_v49  ;;  %v712_v14 = vsub.f32 %v1374_v62, %v694_v4 }
 0x2c0   : > { %v1127_v36 = vpop.eup %1126  ;;  %v692_v57 = vmul.f32 0.6931472, %v1125_v34  ;;  %v783_v37 = vsel %vm767_vm11, %v703_v50, 0.0  ;;  %v1490_v63 = vsel %vm522_vm2, %v703_v50, %v1270_v20  ;;  %v762_v58 = vpop.permute.xlu1 %761 }
 0x2c1   : > { %v682_v32 = vmul.f32 0.6931472, %v1127_v36  ;;  %v807_v18 = vsel %vm522_vm2, %v783_v37, 0.0  ;;  %v792_v40 = vsel %vm776_vm12, %v712_v14, 0.0  ;;  %v1498_v62 = vsel %vm522_vm2, %v712_v14, %v1268_v19  ;;  %v759_v0 = vpop.permute.xlu0 %758 }
 0x2c2   : > { %808 = vadd.xlane.f32.xlu1 %v807_v18  ;;  %v711_v43 = vsub.f32 %v1370_v56, %v692_v57  ;;  %v834_v20 = vsel %vm522_vm2, %v792_v40, 0.0  ;;  %vm778_vm1 = vcmp.eq.s32.totalorder %v762_v58, %v1202_v33  ;;  %vm777_vm0 = vcmp.eq.s32.totalorder %v759_v0, %v1202_v33 }
 0x2c3   : > { %v1129_v7 = vpop.eup %1128  ;;  %v706_v52 = vsub.f32 %v1384_v22, %v682_v32  ;;  %835 = vadd.xlane.f32.xlu0 %v834_v20 }
 0x2c4   : > { %v1131_v60 = vpop.eup %1130  ;;  %v680_v51 = vmul.f32 0.6931472, %v1129_v7  ;;  %v791_v53 = vsel %vm775_vm13, %v711_v43, 0.0  ;;  %v1508_v56 = vsel %vm522_vm2, %v711_v43, %v1272_v21 }
 0x2c5   : > { %v698_v19 = vmul.f32 0.6931472, %v1131_v60  ;;  %v831_v3 = vsel %vm522_vm2, %v791_v53, 0.0  ;;  %v786_v55 = vsel %vm770_vm14, %v706_v52, 0.0  ;;  %v1513_v61 = vsel %vm522_vm2, %v706_v52, %v1282_v26 }
 0x2c6   : > { %832 = vadd.xlane.f32.xlu1 %v831_v3  ;;  %v816_v22 = vsel %vm522_vm2, %v786_v55, 0.0  ;;  %v705_v44 = vsub.f32 %v1380_v8, %v680_v51 }
 0x2c7   : > { %v1133_v9 = vpop.eup %1132  ;;  %v714_v21 = vsub.f32 %v1392_v35, %v698_v19  ;;  %817 = vadd.xlane.f32.xlu0 %v816_v22 }
 0x2c8   : > { %v696_v48 = vmul.f32 0.6931472, %v1133_v9  ;;  %v785_v54 = vsel %vm769_vm15, %v705_v44, 0.0  ;;  %v849_v26 = vsel %vm522_vm2, %v705_v44, %v1286_v28 }
 0x2c9   : > { %v813_v1 = vsel %vm522_vm2, %v785_v54, 0.0  ;;  %v794_v46 = vsel %vm778_vm1, %v714_v21, 0.0  ;;  %v858_v8 = vsel %vm522_vm2, %v714_v21, %v1284_v27 }
 0x2ca   : > { %814 = vadd.xlane.f32.xlu1 %v813_v1  ;;  %v840_v45 = vsel %vm522_vm2, %v794_v46, 0.0  ;;  %v713_v35 = vsub.f32 %v1389_v31, %v696_v48 }
 0x2cb   : > { %841 = vadd.xlane.f32.xlu0 %v840_v45 }
 0x2cc   : > { %v793_v6 = vsel %vm777_vm0, %v713_v35, 0.0  ;;  %v857_v5 = vsel %vm522_vm2, %v713_v35, %v1288_v29 }
 0x2cd   : > { %v837_v28 = vsel %vm522_vm2, %v793_v6, 0.0 }
 0x2ce   : > { %838 = vadd.xlane.f32.xlu1 %v837_v28 }
 0x333   : > { %v800_v33 = vpop.xlane.xlu1 %799 }
 0x334   : > { %v861_v27 = vsel %vm859_vm3, %v1417_v30, %v800_v33 }
 0x335   : > { %878 = vst.msk [vmem:[%s1536_s28 + $0x8] sm:$0xff] %vm876_vm4, %v861_v27 }
 0x337   : > { %v824_v29 = vpop.xlane.xlu0 %823 }
 0x338   : > { %v869_v31 = vsel %vm859_vm3, %v1425_v41, %v824_v29 }
 0x339   : > { %886 = vst.msk [vmem:[%s1536_s28 + $0x48] sm:$0xff] %vm876_vm4, %v869_v31 }
 0x33b   : > { %v797_v24 = vpop.xlane.xlu0 %796 }
 0x33c   : > { %v860_v10 = vsel %vm859_vm3, %v1433_v2, %v797_v24 }
 0x33d   : > { %877 = vst.msk [vmem:[%s1536_s28] sm:$0xff] %vm876_vm4, %v860_v10 }
 0x33f   : > { %v821_v39 = vpop.xlane.xlu1 %820 }
 0x340   : > { %v868_v30 = vsel %vm859_vm3, %v1444_v23, %v821_v39  ;;  %v806_v15 = vpop.xlane.xlu0 %805 }
 0x341   : > { %885 = vst.msk [vmem:[%s1536_s28 + $0x40] sm:$0xff] %vm876_vm4, %v868_v30  ;;  %v863_v41 = vsel %vm859_vm3, %v1449_v47, %v806_v15 }
 0x342   : > { %880 = vst.msk [vmem:[%s1536_s28 + $0x18] sm:$0xff] %vm876_vm4, %v863_v41 }
 0x344   : > { %v830_v13 = vpop.xlane.xlu0 %829 }
 0x345   : > { %v871_v2 = vsel %vm859_vm3, %v1457_v11, %v830_v13 }
 0x346   : > { %888 = vst.msk [vmem:[%s1536_s28 + $0x58] sm:$0xff] %vm876_vm4, %v871_v2 }
 0x348   : > { %v803_v59 = vpop.xlane.xlu0 %802 }
 0x349   : > { %v862_v23 = vsel %vm859_vm3, %v1465_v12, %v803_v59 }
 0x34a   : > { %879 = vst.msk [vmem:[%s1536_s28 + $0x10] sm:$0xff] %vm876_vm4, %v862_v23 }
 0x34b   : > { %v827_v38 = vpop.xlane.xlu1 %826 }
 0x34c   : > { %v870_v47 = vsel %vm859_vm3, %v1476_v17, %v827_v38  ;;  %v812_v4 = vpop.xlane.xlu0 %811 }
 0x34d   : > { %887 = vst.msk [vmem:[%s1536_s28 + $0x50] sm:$0xff] %vm876_vm4, %v870_v47  ;;  %v865_v11 = vsel %vm859_vm3, %v1483_v42, %v812_v4 }
 0x34e   : > { %882 = vst.msk [vmem:[%s1536_s28 + $0x28] sm:$0xff] %vm876_vm4, %v865_v11 }
 0x34f   : > { %v809_v16 = vpop.xlane.xlu1 %808 }
 0x350   : > { %v864_v12 = vsel %vm859_vm3, %v1490_v63, %v809_v16  ;;  %v836_v25 = vpop.xlane.xlu0 %835 }
 0x351   : > { %881 = vst.msk [vmem:[%s1536_s28 + $0x20] sm:$0xff] %vm876_vm4, %v864_v12  ;;  %v873_v17 = vsel %vm859_vm3, %v1498_v62, %v836_v25 }
 0x352   : > { %890 = vst.msk [vmem:[%s1536_s28 + $0x68] sm:$0xff] %vm876_vm4, %v873_v17 }
 0x353   : > { %v833_v49 = vpop.xlane.xlu1 %832 }
 0x354   : > { %v872_v50 = vsel %vm859_vm3, %v1508_v56, %v833_v49  ;;  %v818_v42 = vpop.xlane.xlu0 %817 }
 0x355   : > { %889 = vst.msk [vmem:[%s1536_s28 + $0x60] sm:$0xff] %vm876_vm4, %v872_v50  ;;  %v867_v34 = vsel %vm859_vm3, %v1513_v61, %v818_v42 }
 0x356   : > { %884 = vst.msk [vmem:[%s1536_s28 + $0x38] sm:$0xff] %vm876_vm4, %v867_v34 }
 0x357   : > { %v815_v14 = vpop.xlane.xlu1 %814 }
 0x358   : > { %v866_v36 = vsel %vm859_vm3, %v849_v26, %v815_v14  ;;  %v842_v57 = vpop.xlane.xlu0 %841 }
 0x359   : > { %883 = vst.msk [vmem:[%s1536_s28 + $0x30] sm:$0xff] %vm876_vm4, %v866_v36  ;;  %v875_v37 = vsel %vm859_vm3, %v858_v8, %v842_v57 }
 0x35a   : > { %892 = vst.msk [vmem:[%s1536_s28 + $0x78] sm:$0xff] %vm876_vm4, %v875_v37 }
 0x35b   : > { %v839_v63 = vpop.xlane.xlu1 %838 }
 0x35c   : > { %v874_v32 = vsel %vm859_vm3, %v857_v5, %v839_v63 }
 0x35d   : > { %891 = vst.msk [vmem:[%s1536_s28 + $0x70] sm:$0xff] %vm876_vm4, %v874_v32 }
 0x35e PF: > { %s13_s12 = sadd.s32 1, %s1140_s12  }
 0x35f   : > { %p10_p4 = scmp.ge.s32.totalorder %s13_s12, 4  }
 0x361   :  { %12 = sbr.rel (!%p10_p4) target bundleno = 1 (0x1), region = 65 }

</bundles_post_ra>
